<compile_context>
chip_gen: v5e
topology: v5e:2x2
jax: 0.10.0
libtpu: 0.0.40
codegen_flags: <defaults>
</compile_context>

<pallas_src>
import jax
import jax.numpy as jnp
from jax.experimental import pallas as pl
from jax.experimental.pallas import tpu as pltpu

LEAKY_SLOPE = 0.01  # nn.LeakyReLU default negative_slope
LANES = 128
SUBLANES = 8


def _leaky_relu(x):
    return jnp.where(x > 0, x, LEAKY_SLOPE * x)


def _round_up(n, m):
    return ((n + m - 1) // m) * m


def decoder_kernel(x1_ref, x2_ref,
                   w1a_ref, w1b_ref, w2_ref, w3_ref, w4_ref,
                   bias_ref, out_ref):
    h1 = w1a_ref.shape[1]
    h2 = w2_ref.shape[1]
    h3 = w3_ref.shape[1]
    y_pad = w4_ref.shape[1]

    bias = bias_ref[...]                        # (4, BW) f32, rows = b1..b4 (zero-padded)
    x1 = x1_ref[...].astype(jnp.bfloat16)       # no-op if the producer already emits bf16
    x2 = x2_ref[...].astype(jnp.bfloat16)

    # hidden_layer_1 (fused concat) + LeakyReLU
    h = (jnp.dot(x1, w1a_ref[...], preferred_element_type=jnp.float32)
         + jnp.dot(x2, w1b_ref[...], preferred_element_type=jnp.float32)
         + bias[0:1, :h1])
    h = _leaky_relu(h)

    # hidden_layer_2 + LeakyReLU
    h = jnp.dot(h.astype(jnp.bfloat16), w2_ref[...],
                preferred_element_type=jnp.float32) + bias[1:2, :h2]
    h = _leaky_relu(h)

    # hidden_layer_3 + LeakyReLU
    h = jnp.dot(h.astype(jnp.bfloat16), w3_ref[...],
                preferred_element_type=jnp.float32) + bias[2:3, :h3]
    h = _leaky_relu(h)

    # final_projection (no activation)
    y = jnp.dot(h.astype(jnp.bfloat16), w4_ref[...],
                preferred_element_type=jnp.float32) + bias[3:4, :y_pad]

    # Lane-dense, byte-accurate store: batch is the lane axis of the output
    # block (y_pad, bm).  The transpose rides the otherwise-idle XLU slot.
    out_ref[...] = y.T.astype(out_ref.dtype)


def prepare_kernel_params(params, d1):
    """Split W1 by input rows, cast weights to bf16, pad the final layer to a
    sublane-aligned width, and pack the 4 biases into one (4, BW) f32 slab."""
    w1, w2, w3, w4 = params["w1"], params["w2"], params["w3"], params["w4"]
    h1, h2, h3 = w1.shape[1], w2.shape[1], w3.shape[1]
    y_dim = w4.shape[1]
    y_pad = _round_up(max(y_dim, 1), SUBLANES)   # sublane axis of the transposed output
    bw = max(h1, h2, h3, y_pad)

    w1a = w1[:d1, :].astype(jnp.bfloat16)
    w1b = w1[d1:, :].astype(jnp.bfloat16)
    w2b = w2.astype(jnp.bfloat16)
    w3b = w3.astype(jnp.bfloat16)
    w4p = (jnp.zeros((w4.shape[0], y_pad), jnp.float32)
           .at[:, :y_dim].set(w4).astype(jnp.bfloat16))

    def pad_row(b):
        return jnp.zeros((1, bw), jnp.float32).at[:, :b.shape[1]].set(b)

    bias = jnp.concatenate(
        [pad_row(params["b1"]), pad_row(params["b2"]),
         pad_row(params["b3"]), pad_row(params["b4"])], axis=0)  # (4, bw)

    return dict(w1a=w1a, w1b=w1b, w2=w2b, w3=w3b, w4=w4p, bias=bias,
                y_dim=y_dim, y_pad=y_pad)


def _choose_bm(batch, block_m):
    """Batch-block rows.  Multi-block requires bm % 128 == 0 (bm becomes the
    lane axis of the transposed output block); aim for >= 4 grid steps so the
    'parallel' axis can shard across v7x's two TensorCores and the pipeline has
    work to overlap, while keeping blocks large to amortize ~0.35us/step."""
    if batch < 2 * LANES:
        # Single block: block dims equal the full array dims, so only the
        # sublane (8) alignment of the inputs matters.
        return _round_up(max(batch, 1), SUBLANES)
    bm = _round_up(pl.cdiv(batch, 4), LANES)          # target ~4 steps
    bm = min(bm, max(_round_up(block_m, LANES), LANES))
    return max(bm, LANES)


def _vmem_limit_bytes(kp, bm, d1, d2, in_itemsize):
    """Explicit scoped-VMEM budget: resident weights (double-buffered by the
    auto-pipeline even with constant index_maps) + streamed blocks + headroom."""
    nbytes = lambda a: a.size * a.dtype.itemsize
    resident = 2 * sum(nbytes(kp[k]) for k in ("w1a", "w1b", "w2", "w3", "w4", "bias"))
    streams = 2 * bm * (d1 + d2) * in_itemsize          # double-buffered x1/x2 blocks
    streams += 2 * kp["y_pad"] * bm * 4                 # double-buffered output blocks (f32)
    acts = 4 * bm * kp["w1a"].shape[1] * 4               # f32 intermediate headroom
    limit = int(1.25 * (resident + streams + acts)) + (2 << 20)
    # Clamp to [32 MiB, 64 MiB]: above v5e/v6e/v7x default scoped limits, within
    # v7x's 64 MiB physical VMEM.  TODO(synk): tile W1 instead once this clamps.
    return int(max(32 << 20, min(limit, 64 << 20)))


def decoder_forward(x1, x2, params, *, block_m=2048):
    """Mirrors Decoder.forward: Linear4(LReLU(Linear3(LReLU(Linear2(LReLU(Linear1(cat[x1,x2])))))))."""
    kp = prepare_kernel_params(params, x1.shape[1])
    batch = x1.shape[0]
    d1, d2 = x1.shape[1], x2.shape[1]
    y_dim, y_pad = kp["y_dim"], kp["y_pad"]

    bm = _choose_bm(batch, block_m)
    padded_batch = _round_up(batch, bm)
    if padded_batch != batch:
        pad = padded_batch - batch
        x1 = jnp.pad(x1, ((0, pad), (0, 0)))
        x2 = jnp.pad(x2, ((0, pad), (0, 0)))

    grid = (padded_batch // bm,)

    row_map = lambda i: (i, 0)      # batch-blocked inputs: batch on the sublane axis
    col_map = lambda i: (0, i)      # transposed output: batch on the lane axis
    const_map = lambda i: (0, 0)    # weights/biases: VMEM-resident across steps

    out_t = pl.pallas_call(
        decoder_kernel,
        out_shape=jax.ShapeDtypeStruct((y_pad, padded_batch), jnp.float32),
        grid=grid,
        in_specs=[
            pl.BlockSpec((bm, d1), row_map),
            pl.BlockSpec((bm, d2), row_map),
            pl.BlockSpec(kp["w1a"].shape, const_map),
            pl.BlockSpec(kp["w1b"].shape, const_map),
            pl.BlockSpec(kp["w2"].shape, const_map),
            pl.BlockSpec(kp["w3"].shape, const_map),
            pl.BlockSpec(kp["w4"].shape, const_map),
            pl.BlockSpec(kp["bias"].shape, const_map),
        ],
        out_specs=pl.BlockSpec((y_pad, bm), col_map),
        compiler_params=pltpu.CompilerParams(
            dimension_semantics=("parallel",),
            vmem_limit_bytes=_vmem_limit_bytes(kp, bm, d1, d2, x1.dtype.itemsize),
        ),
    )(x1, x2, kp["w1a"], kp["w1b"], kp["w2"], kp["w3"], kp["w4"], kp["bias"])

    # Tiny (y_pad, padded_batch) slab -> (batch, y_dim); this transpose is over
    # ~16x fewer bytes than the previous 128-lane-padded slice.
    return out_t[:y_dim, :batch].T


def init_decoder_params(key, x_dim, y_dim):
    """Deterministic synthetic init; weights stored as (in, out), f32 (torch-equivalent)."""
    h1 = x_dim
    h2 = x_dim // 2
    h3 = h2 // 2
    dims = [(x_dim, h1), (h1, h2), (h2, h3), (h3, y_dim)]
    params = {}
    keys = jax.random.split(key, 2 * len(dims))
    for i, (din, dout) in enumerate(dims):
        bound = 1.0 / (din ** 0.5)  # same bound PyTorch Linear uses
        w = jax.random.uniform(keys[2 * i], (din, dout), jnp.float32, -bound, bound)
        b = jax.random.uniform(keys[2 * i + 1], (1, dout), jnp.float32, -bound, bound)
        params[f"w{i + 1}"] = w
        params[f"b{i + 1}"] = b
    return params


def decoder_reference(x1, x2, params):
    """Pure-JAX reference matching the kernel's bf16-weight / f32-accumulate math.
    NOTE: lower precision than the f32 PyTorch module (bf16 MXU inputs)."""
    def bdot(a, w):
        return jnp.dot(a.astype(jnp.bfloat16), w.astype(jnp.bfloat16),
                       preferred_element_type=jnp.float32)
    h = jnp.concatenate([x1, x2], axis=1)
    h = _leaky_relu(bdot(h, params["w1"]) + params["b1"])
    h = _leaky_relu(bdot(h, params["w2"]) + params["b2"])
    h = _leaky_relu(bdot(h, params["w3"]) + params["b3"])
    return bdot(h, params["w4"]) + params["b4"]


if __name__ == "__main__":
    key = jax.random.PRNGKey(0)
    k_x1, k_x2, k_p, k_y1, k_y2 = jax.random.split(key, 5)

    # x1, x2 concatenated along dim=1 -> x_dim = 16 + 16 = 32
    d1, d2, y_dim = 16, 16, 4
    x_dim = d1 + d2
    params = init_decoder_params(k_p, x_dim, y_dim)

    # Small single-block case (batch=8)
    batch = 8
    x1 = jax.random.normal(k_x1, (batch, d1), jnp.float32)
    x2 = jax.random.normal(k_x2, (batch, d2), jnp.float32)
    y = decoder_forward(x1, x2, params)
    jax.block_until_ready(y)
    y_ref = decoder_reference(x1, x2, params)
    assert y.shape == (batch, y_dim), y.shape
    assert jnp.allclose(y, y_ref, atol=1e-2, rtol=1e-2), float(jnp.abs(y - y_ref).max())

    # Multi-block case (exercises batch padding, 128-aligned blocks, grid > 1)
    batch2 = 300
    x1b = jax.random.normal(k_y1, (batch2, d1), jnp.float32)
    x2b = jax.random.normal(k_y2, (batch2, d2), jnp.float32)
    yb = decoder_forward(x1b, x2b, params)
    jax.block_until_ready(yb)
    yb_ref = decoder_reference(x1b, x2b, params)
    assert yb.shape == (batch2, y_dim), yb.shape
    assert jnp.allclose(yb, yb_ref, atol=1e-2, rtol=1e-2), float(jnp.abs(yb - yb_ref).max())

    print("KERNEL_OK")
</pallas_src>

<mosaic_0001>
module attributes {stable_mosaic.version = 11 : i64} {
  func.func @decoder_kernel(%arg0: i32, %arg1: memref<8x16xf32, #tpu.memory_space<vmem>>, %arg2: memref<8x16xf32, #tpu.memory_space<vmem>>, %arg3: memref<16x32xbf16, #tpu.memory_space<vmem>>, %arg4: memref<16x32xbf16, #tpu.memory_space<vmem>>, %arg5: memref<32x16xbf16, #tpu.memory_space<vmem>>, %arg6: memref<16x8xbf16, #tpu.memory_space<vmem>>, %arg7: memref<8x8xbf16, #tpu.memory_space<vmem>>, %arg8: memref<4x32xf32, #tpu.memory_space<vmem>>, %arg9: memref<8x8xf32, #tpu.memory_space<vmem>>) attributes {dimension_semantics = [#tpu.dimension_semantics<parallel>], iteration_bounds = array<i64: 1>, scalar_prefetch = 0 : i64, scratch_operands = 0 : i64, tpu.core_type = #tpu.core_type<tc>, window_params = [{transform_indices = @transform_0, window_bounds = array<i64: 8, 16>}, {transform_indices = @transform_1, window_bounds = array<i64: 8, 16>}, {pipeline_mode = #tpu.pipeline_mode<synchronous>, transform_indices = @transform_2, window_bounds = array<i64: 16, 32>}, {pipeline_mode = #tpu.pipeline_mode<synchronous>, transform_indices = @transform_3, window_bounds = array<i64: 16, 32>}, {pipeline_mode = #tpu.pipeline_mode<synchronous>, transform_indices = @transform_4, window_bounds = array<i64: 32, 16>}, {pipeline_mode = #tpu.pipeline_mode<synchronous>, transform_indices = @transform_5, window_bounds = array<i64: 16, 8>}, {pipeline_mode = #tpu.pipeline_mode<synchronous>, transform_indices = @transform_6, window_bounds = array<i64: 8, 8>}, {pipeline_mode = #tpu.pipeline_mode<synchronous>, transform_indices = @transform_7, window_bounds = array<i64: 4, 32>}, {transform_indices = @transform_8, window_bounds = array<i64: 8, 8>}]} {
    %c0 = arith.constant 0 : index
    %c0_0 = arith.constant 0 : index
    %0 = vector.load %arg8[%c0, %c0_0] : memref<4x32xf32, #tpu.memory_space<vmem>>, vector<4x32xf32>
    %c0_1 = arith.constant 0 : index
    %c0_2 = arith.constant 0 : index
    %1 = vector.load %arg1[%c0_1, %c0_2] : memref<8x16xf32, #tpu.memory_space<vmem>>, vector<8x16xf32>
    %2 = arith.truncf %1 : vector<8x16xf32> to vector<8x16xbf16>
    %c0_3 = arith.constant 0 : index
    %c0_4 = arith.constant 0 : index
    %3 = vector.load %arg2[%c0_3, %c0_4] : memref<8x16xf32, #tpu.memory_space<vmem>>, vector<8x16xf32>
    %4 = arith.truncf %3 : vector<8x16xf32> to vector<8x16xbf16>
    %c0_5 = arith.constant 0 : index
    %c0_6 = arith.constant 0 : index
    %5 = vector.load %arg3[%c0_5, %c0_6] : memref<16x32xbf16, #tpu.memory_space<vmem>>, vector<16x32xbf16>
    %cst = arith.constant dense<0.000000e+00> : vector<8x32xf32>
    %6 = tpu.matmul %2, %5, %cst {dimension_numbers = #tpu.dot_dimension_numbers<[1], [0], [0], [1], [0, 0, 1, 1], [], []>} : vector<8x16xbf16>, vector<16x32xbf16>, vector<8x32xf32> -> vector<8x32xf32>
    %c0_7 = arith.constant 0 : index
    %c0_8 = arith.constant 0 : index
    %7 = vector.load %arg4[%c0_7, %c0_8] : memref<16x32xbf16, #tpu.memory_space<vmem>>, vector<16x32xbf16>
    %cst_9 = arith.constant dense<0.000000e+00> : vector<8x32xf32>
    %8 = tpu.matmul %4, %7, %cst_9 {dimension_numbers = #tpu.dot_dimension_numbers<[1], [0], [0], [1], [0, 0, 1, 1], [], []>} : vector<8x16xbf16>, vector<16x32xbf16>, vector<8x32xf32> -> vector<8x32xf32>
    %9 = arith.addf %6, %8 : vector<8x32xf32>
    %10 = vector.extract_strided_slice %0 {offsets = [0, 0], sizes = [1, 32], strides = [1, 1]} : vector<4x32xf32> to vector<1x32xf32>
    %11 = vector.broadcast %10 : vector<1x32xf32> to vector<8x32xf32>
    %12 = arith.addf %9, %11 : vector<8x32xf32>
    %cst_10 = arith.constant 0.000000e+00 : f32
    %13 = vector.broadcast %cst_10 : f32 to vector<8x32xf32>
    %14 = arith.cmpf ogt, %12, %13 : vector<8x32xf32>
    %cst_11 = arith.constant 0.00999999977 : f32
    %15 = vector.broadcast %cst_11 : f32 to vector<8x32xf32>
    %16 = arith.mulf %15, %12 : vector<8x32xf32>
    %17 = arith.select %14, %12, %16 : vector<8x32xi1>, vector<8x32xf32>
    %18 = arith.truncf %17 : vector<8x32xf32> to vector<8x32xbf16>
    %c0_12 = arith.constant 0 : index
    %c0_13 = arith.constant 0 : index
    %19 = vector.load %arg5[%c0_12, %c0_13] : memref<32x16xbf16, #tpu.memory_space<vmem>>, vector<32x16xbf16>
    %cst_14 = arith.constant dense<0.000000e+00> : vector<8x16xf32>
    %20 = tpu.matmul %18, %19, %cst_14 {dimension_numbers = #tpu.dot_dimension_numbers<[1], [0], [0], [1], [0, 0, 1, 1], [], []>} : vector<8x32xbf16>, vector<32x16xbf16>, vector<8x16xf32> -> vector<8x16xf32>
    %21 = vector.extract_strided_slice %0 {offsets = [1, 0], sizes = [1, 16], strides = [1, 1]} : vector<4x32xf32> to vector<1x16xf32>
    %22 = vector.broadcast %21 : vector<1x16xf32> to vector<8x16xf32>
    %23 = arith.addf %20, %22 : vector<8x16xf32>
    %cst_15 = arith.constant 0.000000e+00 : f32
    %24 = vector.broadcast %cst_15 : f32 to vector<8x16xf32>
    %25 = arith.cmpf ogt, %23, %24 : vector<8x16xf32>
    %cst_16 = arith.constant 0.00999999977 : f32
    %26 = vector.broadcast %cst_16 : f32 to vector<8x16xf32>
    %27 = arith.mulf %26, %23 : vector<8x16xf32>
    %28 = arith.select %25, %23, %27 : vector<8x16xi1>, vector<8x16xf32>
    %29 = arith.truncf %28 : vector<8x16xf32> to vector<8x16xbf16>
    %c0_17 = arith.constant 0 : index
    %c0_18 = arith.constant 0 : index
    %30 = vector.load %arg6[%c0_17, %c0_18] : memref<16x8xbf16, #tpu.memory_space<vmem>>, vector<16x8xbf16>
    %cst_19 = arith.constant dense<0.000000e+00> : vector<8x8xf32>
    %31 = tpu.matmul %29, %30, %cst_19 {dimension_numbers = #tpu.dot_dimension_numbers<[1], [0], [0], [1], [0, 0, 1, 1], [], []>} : vector<8x16xbf16>, vector<16x8xbf16>, vector<8x8xf32> -> vector<8x8xf32>
    %32 = vector.extract_strided_slice %0 {offsets = [2, 0], sizes = [1, 8], strides = [1, 1]} : vector<4x32xf32> to vector<1x8xf32>
    %33 = vector.broadcast %32 : vector<1x8xf32> to vector<8x8xf32>
    %34 = arith.addf %31, %33 : vector<8x8xf32>
    %cst_20 = arith.constant 0.000000e+00 : f32
    %35 = vector.broadcast %cst_20 : f32 to vector<8x8xf32>
    %36 = arith.cmpf ogt, %34, %35 : vector<8x8xf32>
    %cst_21 = arith.constant 0.00999999977 : f32
    %37 = vector.broadcast %cst_21 : f32 to vector<8x8xf32>
    %38 = arith.mulf %37, %34 : vector<8x8xf32>
    %39 = arith.select %36, %34, %38 : vector<8x8xi1>, vector<8x8xf32>
    %40 = arith.truncf %39 : vector<8x8xf32> to vector<8x8xbf16>
    %c0_22 = arith.constant 0 : index
    %c0_23 = arith.constant 0 : index
    %41 = vector.load %arg7[%c0_22, %c0_23] : memref<8x8xbf16, #tpu.memory_space<vmem>>, vector<8x8xbf16>
    %cst_24 = arith.constant dense<0.000000e+00> : vector<8x8xf32>
    %42 = tpu.matmul %40, %41, %cst_24 {dimension_numbers = #tpu.dot_dimension_numbers<[1], [0], [0], [1], [0, 0, 1, 1], [], []>} : vector<8x8xbf16>, vector<8x8xbf16>, vector<8x8xf32> -> vector<8x8xf32>
    %43 = vector.extract_strided_slice %0 {offsets = [3, 0], sizes = [1, 8], strides = [1, 1]} : vector<4x32xf32> to vector<1x8xf32>
    %44 = vector.broadcast %43 : vector<1x8xf32> to vector<8x8xf32>
    %45 = arith.addf %42, %44 : vector<8x8xf32>
    %46 = tpu.transpose %45, [1, 0] : vector<8x8xf32> -> vector<8x8xf32>
    %c0_25 = arith.constant 0 : index
    %c0_26 = arith.constant 0 : index
    %47 = vector.load %arg9[%c0_25, %c0_26] : memref<8x8xf32, #tpu.memory_space<vmem>>, vector<8x8xf32>
    tpu.vector_store %arg9[%c0_25, %c0_26], %46 {strides = array<i32>} : memref<8x8xf32, #tpu.memory_space<vmem>>, vector<8x8xf32>,
    return
  }
  func.func @transform_0(%arg0: i32) -> (i32, i32) {
    %c0_i32 = arith.constant 0 : i32
    %c0_i32_0 = arith.constant 0 : i32
    return %arg0, %c0_i32 : i32, i32
  }
  func.func @transform_1(%arg0: i32) -> (i32, i32) {
    %c0_i32 = arith.constant 0 : i32
    %c0_i32_0 = arith.constant 0 : i32
    return %arg0, %c0_i32 : i32, i32
  }
  func.func @transform_2(%arg0: i32) -> (i32, i32) {
    %c0_i32 = arith.constant 0 : i32
    %c0_i32_0 = arith.constant 0 : i32
    %c0_i32_1 = arith.constant 0 : i32
    return %c0_i32, %c0_i32_0 : i32, i32
  }
  func.func @transform_3(%arg0: i32) -> (i32, i32) {
    %c0_i32 = arith.constant 0 : i32
    %c0_i32_0 = arith.constant 0 : i32
    %c0_i32_1 = arith.constant 0 : i32
    return %c0_i32, %c0_i32_0 : i32, i32
  }
  func.func @transform_4(%arg0: i32) -> (i32, i32) {
    %c0_i32 = arith.constant 0 : i32
    %c0_i32_0 = arith.constant 0 : i32
    %c0_i32_1 = arith.constant 0 : i32
    return %c0_i32, %c0_i32_0 : i32, i32
  }
  func.func @transform_5(%arg0: i32) -> (i32, i32) {
    %c0_i32 = arith.constant 0 : i32
    %c0_i32_0 = arith.constant 0 : i32
    %c0_i32_1 = arith.constant 0 : i32
    return %c0_i32, %c0_i32_0 : i32, i32
  }
  func.func @transform_6(%arg0: i32) -> (i32, i32) {
    %c0_i32 = arith.constant 0 : i32
    %c0_i32_0 = arith.constant 0 : i32
    %c0_i32_1 = arith.constant 0 : i32
    return %c0_i32, %c0_i32_0 : i32, i32
  }
  func.func @transform_7(%arg0: i32) -> (i32, i32) {
    %c0_i32 = arith.constant 0 : i32
    %c0_i32_0 = arith.constant 0 : i32
    %c0_i32_1 = arith.constant 0 : i32
    return %c0_i32, %c0_i32_0 : i32, i32
  }
  func.func @transform_8(%arg0: i32) -> (i32, i32) {
    %c0_i32 = arith.constant 0 : i32
    %c0_i32_0 = arith.constant 0 : i32
    return %c0_i32, %arg0 : i32, i32
  }
}

</mosaic_0001>

<bundles_post_ra>
// kernel: tpu_custom_call.1
= control target key start
LH: loop header
LB: loop body
LE: loop exit
PB: predicated region body
PF: predicated region fallthrough
CT: control target
= control target key end

     0   :  { %13 = vsyncpa [#allocation3], 0  ;;  %s459_s0 = inlined_call_operand.vmem [shape: f32[8,16], index: 0, kind: input, shape index: {}]   ;;  %s460_s1 = inlined_call_operand.vmem [shape: f32[8,16], index: 1, kind: input, shape index: {}]   ;;  %s461_s2 = inlined_call_operand.vmem [shape: bf16[16,32], index: 2, kind: input, shape index: {}]   ;;  %s462_s3 = inlined_call_operand.hbm [shape: bf16[16,32], index: 3, kind: input, shape index: {}]   ;;  %s463_s4 = inlined_call_operand.vmem [shape: bf16[32,16], index: 4, kind: input, shape index: {}]   ;;  %s464_s5 = inlined_call_operand.vmem [shape: bf16[16,8], index: 5, kind: input, shape index: {}]   ;;  %s465_s6 = inlined_call_operand.vmem [shape: bf16[8,8], index: 6, kind: input, shape index: {}]   ;;  %s466_s7 = inlined_call_operand.hbm [shape: f32[4,32], index: 7, kind: input, shape index: {}]   ;;  %s467_s8 = inlined_call_operand.hbm [shape: f32[8,8], index: 8, kind: output, shape index: {}]  }
   0x1   :  { %14 = vsyncpa [#allocation6], 0 }
   0x2   :  { %15 = vsyncpa [#allocation4], 0  ;;  %s26_s29 = sshll.u32 %s462_s3, 4  ;;  %s376_s30 = smov [#allocation2]   ;;  %s27_s29 = int_to_ptr.hbm [resolvable:$true] %s26_s29 }
   0x3   :  { %s28_s9 = sshll.u32 %s376_s30, 4  ;;  %s46_s12 = sshll.u32 %s466_s7, 4  ;;  %s29_s9 = int_to_ptr.vmem [resolvable:$true] %s28_s9  ;;  %s47_s12 = int_to_ptr.hbm [resolvable:$true] %s46_s12 }
   0x4   :  { %s377_s13 = smov 64   ;;  %s378_s14 = smov 4  }
   0x5   :  { %34 = dma.hbm_to_vmem [thread:$0]  %s27_s29, 128, %s29_s9, [#allocation3], %s377_s13, %s377_s13, %s378_s14  }
   0x6   :  { %s379_s15 = smov [#allocation5]  }
   0x7   :  { %s48_s16 = sshll.u32 %s379_s15, 4  ;;  %s49_s16 = int_to_ptr.vmem [resolvable:$true] %s48_s16 }
   0x8   :  { %51 = dma.hbm_to_vmem [thread:$0]  %s47_s12, 64, %s49_s16, [#allocation6]  }
   0x9   :  { %370 = dma.done.wait [#allocation3], 128  }
   0xa   :  { %371 = vsyncadd [#allocation3], 4294967168 }
   0xb   :  { %372 = dma.done.wait [#allocation6], 64  }
   0xc   :  { %373 = vsyncadd [#allocation6], 4294967232  ;;  %v288_v0 = vld [vmem:[#allocation2] sm:$0xff]  ;;  %vm76_vm0 = vcmask 130048   ;;  %v290_v6 = vld [vmem:[%s463_s4 + $0x8] sm:$0xff]  ;;  %vm138_vm2 = vcmask 261120  }
   0xd   :  { %v287_v1 = vld [vmem:[%s461_s2] sm:$0xff]  ;;  %87 = vmatpush.bf16.msra.mxu0 %v288_v0  ;;  %148 = vmatpush.bf16.msra.mxu2 %v290_v6  ;;  %v61_v8 = vld [vmem:[#allocation5] sm:$0xf]  ;;  %vm194_vm3 = vcmask 1043456   ;;  %vm190_vm6 = vcmask 64512   ;;  %s251_s27 = sshll.u32 %s467_s8, 4  ;;  %s252_s27 = int_to_ptr.hbm [resolvable:$true] %s251_s27 }
   0xe   :  { %v64_v2 = vld [vmem:[%s460_s1] sm:$0xff]  ;;  %109 = vmatpush.bf16.msra.mxu1 %v287_v1  ;;  %v115_v9 = vperm.slane %v61_v8, 0  ;;  %v125_v22 = vperm.slane %v61_v8, 1  ;;  %v161_v29 = vperm.slane %v61_v8, 2  ;;  %v189_v36 = vperm.slane %v61_v8, 3 }
   0xf   :  { %v65_v3 = vpack.c.bf16 %v64_v2, %v64_v2  ;;  %v62_v4 = vld [vmem:[%s459_s0] sm:$0xff] }
  0x10   :  { %v63_v5 = vpack.c.bf16 %v62_v4, %v62_v4  ;;  %v289_v7 = vld [vmem:[%s463_s4] sm:$0xff] }
  0x11   :  { %266 = vmatmul.msk.bf16.vlgmr.msra.gmra.mxu0 %vm76_vm0, %v65_v3  ;;  %149 = vmatpush.bf16.msra.mxu2 %v289_v7  ;;  %v291_v19 = vld [vmem:[%s464_s5] sm:$0xff]  ;;  %s380_s5 = smov [#allocation7]  }
  0x12   :  { %271 = vmatmul.msk.bf16.vlgmr.msra.gmra.mxu1 %vm76_vm0, %v63_v5  ;;  %178 = vmatpush.bf16.msra.mxu3 %v291_v19  ;;  %v188_v20 = vld [vmem:[%s465_s6] sm:$0xf]  ;;  %s249_s6 = sshll.u32 %s380_s5, 4  ;;  %s250_s6 = int_to_ptr.vmem [resolvable:$true] %s249_s6 }
  0x13   :  { %v196_v21 = vsel %vm194_vm3, %v188_v20, 0 }
  0x14   :  { %205 = vmatpush.bf16.msrb.mxu0 %v196_v21 }
  0x8e   :  { %v89_v10 = vpop.f32.mrf.mxu0 }
  0x8f   :  { %v111_v11 = vpop.f32.mrf.mxu1 }
  0x90   :  { %v112_v12 = vadd.f32 %v111_v11, %v89_v10 }
  0x92   :  { %v116_v13 = vadd.f32 %v115_v9, %v112_v12 }
  0x94   :  { %v118_v14 = vmul.f32 0.01, %v116_v13  ;;  %vm117_vm1 = vcmp.gt.f32.partialorder %v116_v13, 0.0 }
  0x96   :  { %v119_v15 = vsel %vm117_vm1, %v116_v13, %v118_v14  ;;  %v91_v16 = vpop.f32.mrf.mxu0 }
  0x97   :  { %v113_v17 = vpop.f32.mrf.mxu1  ;;  %v120_v18 = vpack.c.bf16 %v119_v15, %v119_v15 }
  0x99   :  { %280 = vmatmul.msk.bf16.vlgmr.msra.gmra.mxu2 %vm138_vm2, %v120_v18 }
 0x11c   :  { %v151_v23 = vpop.f32.mrf.mxu2 }
 0x11d   :  { %v152_v24 = vadd.f32 %v151_v23, %v125_v22 }
 0x11f   :  { %vm155_vm4 = vcmp.gt.f32.partialorder %v152_v24, 0.0  ;;  %v156_v25 = vmul.f32 0.01, %v152_v24 }
 0x121   :  { %v157_v26 = vsel %vm155_vm4, %v152_v24, %v156_v25 }
 0x122   :  { %v158_v27 = vpack.c.bf16 %v157_v26, %v157_v26 }
 0x124   :  { %v153_v28 = vpop.f32.mrf.mxu2  ;;  %285 = vmatmul.msk.bf16.vlgmr.msra.gmra.mxu3 %vm76_vm0, %v158_v27 }
 0x1a7   :  { %v180_v30 = vpop.f32.mrf.mxu3 }
 0x1a8   :  { %v181_v31 = vadd.f32 %v180_v30, %v161_v29 }
 0x1aa   :  { %vm184_vm5 = vcmp.gt.f32.partialorder %v181_v31, 0.0  ;;  %v185_v32 = vmul.f32 0.01, %v181_v31 }
 0x1ac   :  { %v186_v33 = vsel %vm184_vm5, %v181_v31, %v185_v32 }
 0x1ad   :  { %v187_v34 = vpack.c.bf16 %v186_v33, %v186_v33 }
 0x1af   :  { %v182_v35 = vpop.f32.mrf.mxu3  ;;  %286 = vmatmul.msk.bf16.vlgmr.msrb.gmra.mxu0 %vm190_vm6, %v187_v34 }
 0x22c   :  { %v207_v37 = vpop.f32.mrf.mxu0 }
 0x22d   :  { %v208_v38 = vadd.f32 %v207_v37, %v189_v36 }
 0x22f   :  { %211 = vxpose.xlu0.b32.start.end [1/1] (short) (narrow) %v208_v38, 8 }
 0x234   :  { %v209_v39 = vpop.f32.mrf.mxu0 }
 0x2d3   :  { %v227_v40 = vpop.trf.xlu0 }
 0x2d4   :  { %243 = vst.msk [vmem:[#allocation7] sm:$0xff] %vm190_vm6, %v227_v40 }
 0x2d5   :  { %254 = dma.vmem_to_hbm [thread:$0]  %s250_s6, 128, %s252_s27, [#allocation4]  }
 0x2d6   :  { %374 = dma.done.wait [#allocation4], 128  }
 0x2d7   :  { %375 = vsyncadd [#allocation4], 4294967168 }
 0x2d8   :  { %259 = vsyncpa [#allocation3], 1 }
 0x2d9   :  { %260 = vsyncpa [#allocation6], 1 }
 0x2da   :  { %261 = vsyncpa [#allocation4], 1 }

</bundles_post_ra>
